<compile_context>
chip_gen: v7x
topology: tpu7x:2x2x1
jax: 0.10.0
libtpu: 0.0.40
codegen_flags: <defaults>
</compile_context>

<pallas_src>
from functools import partial

import numpy as np
import jax
import jax.numpy as jnp
from jax.experimental import pallas as pl
from jax.experimental.pallas import tpu as pltpu

IN_CH, HIN, WIN = 32, 4, 4          # module hardcodes 32 * 4 * 4 input features
FEAT = IN_CH * HIN * WIN            # 512
HID = 1024                          # fc1 width (only used for the offline fold)


# ---------------------------------------------------------------------------
# Fused kernel: theta = fold(x); grid = affine_grid(theta); rois = grid_sample(x, grid)
# ---------------------------------------------------------------------------
def stn_kernel(x_ref, wf_ref, b_ref, aux_ref, img_ref, grid_ref, rois_ref, *, N, Hin, Win):
    f32 = jnp.float32
    HQ = Hin * Win
    NP = aux_ref.shape[1]                                             # N * H * W  (128 here)

    # ---- folded localization net: theta^T = W_fold^T @ x^T + b_fold^T  (f32 MXU, K=512) ----
    theta_t = jax.lax.dot_general(
        wf_ref[...], x_ref[...], (((1,), (1,)), ((), ())),
        preferred_element_type=f32) + b_ref[...]                      # (6, N)

    # ---- affine_grid (align_corners=False) in lane-dense (2, N*H*W) layout ----
    e = aux_ref[0:N, :]                                               # (N, NP) block one-hot
    xs = aux_ref[N:N + 1, :]                                          # (1, NP) x-basis, tiled per n
    ys = aux_ref[N + 1:N + 2, :]                                      # (1, NP) y-basis, tiled per n
    noff = aux_ref[N + 2:N + 3, :].astype(jnp.int32)                  # (1, NP) per-column n*Hin*Win

    # Broadcast theta over each sample's pixels with one tiny matmul (replaces 6 lane broadcasts).
    t_full = jnp.dot(theta_t, e, preferred_element_type=f32)          # (6, NP)
    gx = t_full[0:1, :] * xs + t_full[1:2, :] * ys + t_full[2:3, :]   # (1, NP)
    gy = t_full[3:4, :] * xs + t_full[4:5, :] * ys + t_full[5:6, :]   # (1, NP)
    grid_ref[...] = jnp.concatenate([gx, gy], axis=0)                 # (2, NP) single full-width store

    # ---- grid_sample: bilinear, zeros padding, align_corners=False ----
    ix = (gx + 1.0) * (0.5 * Win) - 0.5
    iy = (gy + 1.0) * (0.5 * Hin) - 0.5
    x0f = jnp.floor(ix)
    y0f = jnp.floor(iy)
    x0 = x0f.astype(jnp.int32)
    y0 = y0f.astype(jnp.int32)
    x1 = x0 + 1
    y1 = y0 + 1
    wx1 = ix - x0f
    wx0 = 1.0 - wx1
    wy1 = iy - y0f
    wy0 = 1.0 - wy1

    # Block-diagonal one-hot sampling matrix for the WHOLE batch: S_all[n'*HQ+q, n*P+p].
    row_code = jax.lax.broadcasted_iota(jnp.int32, (N * HQ, NP), 0)

    def corner(xc, yc, wgt):
        valid = (xc >= 0) & (xc < Win) & (yc >= 0) & (yc < Hin)
        idx = jnp.where(valid, noff + yc * Win + xc, -1)              # -1 never matches row_code
        w = jnp.where(valid, wgt, 0.0)
        return jnp.where(row_code == idx, w, 0.0)                     # (N*HQ, NP)

    s_all = (corner(x0, y0, wx0 * wy0) + corner(x1, y0, wx1 * wy0)
             + corner(x0, y1, wx0 * wy1) + corner(x1, y1, wx1 * wy1))

    # rois (C, N*H*W) in ONE MXU matmul, lane-dense (32, 128) store.
    rois_ref[...] = jnp.dot(img_ref[...], s_all,
                            preferred_element_type=f32).astype(rois_ref.dtype)


# ---------------------------------------------------------------------------
# One-time parameter fold (f32) — do this outside the per-step jit.
# ---------------------------------------------------------------------------
def fold_localization_params(params):
    """fc1/fc2 have no activation between them: fold into a single (6, 512) affine map (f32)."""
    w1 = params["w1"].astype(jnp.float32)           # (512, 1024), input-major: fc1(x) = x @ w1 + b1
    w2 = params["w2"].astype(jnp.float32)           # (1024, 6)
    b1 = params["b1"].astype(jnp.float32).reshape(1, -1)
    b2 = params["b2"].astype(jnp.float32).reshape(1, -1)
    w_fold = w1 @ w2                                # (512, 6)
    b_fold = b1 @ w2 + b2                           # (1, 6)
    return {"wf_t": w_fold.T, "b_t": b_fold.T}      # (6, 512) contiguous, (6, 1)


# ---------------------------------------------------------------------------
# Module-level wrapper (glue only: layout prep + output reshapes)
# ---------------------------------------------------------------------------
def spatial_transformer(x, folded, spatial_dims):
    H, W = spatial_dims
    N = x.shape[0]
    P = H * W
    NP = N * P
    HQ = HIN * WIN

    x_flat = x.reshape(N, FEAT)                                       # (N, 512)   MLP operand
    img_t = jnp.transpose(x.reshape(N, IN_CH, HQ), (1, 0, 2)).reshape(IN_CH, N * HQ)   # (32, N*16)

    # Static constants for this (N, H, W): block one-hot E, affine_grid basis rows, batch offsets.
    p = np.arange(P)
    xs = (2.0 * (p % W) + 1.0) / W - 1.0                              # align_corners=False x-basis
    ys = (2.0 * (p // W) + 1.0) / H - 1.0
    aux = np.concatenate(
        [np.repeat(np.eye(N), P, axis=1),                             # (N, NP)  E
         np.tile(xs, N)[None, :],                                     # (1, NP)  xs tiled per n
         np.tile(ys, N)[None, :],                                     # (1, NP)  ys tiled per n
         (np.repeat(np.arange(N), P) * HQ)[None, :]],                 # (1, NP)  n*Hin*Win
        axis=0).astype(np.float32)                                    # (N+3, NP)
    aux = jnp.asarray(aux)

    kern = partial(stn_kernel, N=N, Hin=HIN, Win=WIN)
    grid_flat, rois_flat = pl.pallas_call(
        kern,
        out_shape=(
            jax.ShapeDtypeStruct((2, NP), jnp.float32),
            jax.ShapeDtypeStruct((IN_CH, NP), jnp.float32),
        ),
        grid=(1,),
        in_specs=[
            pl.BlockSpec((N, FEAT), lambda i: (0, 0)),
            pl.BlockSpec((6, FEAT), lambda i: (0, 0)),
            pl.BlockSpec((6, 1), lambda i: (0, 0)),
            pl.BlockSpec((N + 3, NP), lambda i: (0, 0)),
            pl.BlockSpec((IN_CH, N * HQ), lambda i: (0, 0)),
        ],
        out_specs=(
            pl.BlockSpec((2, NP), lambda i: (0, 0)),
            pl.BlockSpec((IN_CH, NP), lambda i: (0, 0)),
        ),
        compiler_params=pltpu.CompilerParams(dimension_semantics=("arbitrary",)),
    )(x_flat, folded["wf_t"], folded["b_t"], aux, img_t)

    # grid_flat row 0/1 = x/y coords over columns n*P + h*W + w -> PyTorch affine_grid (N, H, W, 2)
    affine_grid_points = grid_flat.reshape(2, N, H, W).transpose(1, 2, 3, 0)
    # rois_flat (C, N*P) -> NCHW like grid_sample output
    rois = rois_flat.reshape(IN_CH, N, H, W).transpose(1, 0, 2, 3)
    return rois, affine_grid_points


if __name__ == "__main__":
    spatial_dims = (8, 8)

    key = jax.random.PRNGKey(0)
    k1, k2, k3, kx = jax.random.split(key, 4)
    # nn.Linear(512, 1024) / nn.Linear(1024, 6) parameters, stored input-major for x @ W + b (f32).
    params = {
        "w1": jax.random.normal(k1, (FEAT, HID), jnp.float32) * 0.02,
        "b1": jnp.zeros((1, HID), jnp.float32),
        "w2": jax.random.normal(k3, (HID, 6), jnp.float32) * 0.02,
        # bias near the identity affine so the sampled grid stays mostly in-bounds
        "b2": jnp.array([[1.0, 0.0, 0.0, 0.0, 1.0, 0.0]], jnp.float32),
    }
    folded = fold_localization_params(params)      # one-time fold, outside the per-step jit

    x = jax.random.normal(kx, (2, IN_CH, HIN, WIN), jnp.float32)      # NCHW, 32*4*4 = 512 features

    fwd = jax.jit(partial(spatial_transformer, spatial_dims=spatial_dims))
    rois, grid = fwd(x, folded)
    jax.block_until_ready((rois, grid))

    assert rois.shape == (2, IN_CH, spatial_dims[0], spatial_dims[1])
    assert grid.shape == (2, spatial_dims[0], spatial_dims[1], 2)
    print("KERNEL_OK")
</pallas_src>

<mosaic_0001>
module attributes {stable_mosaic.version = 11 : i64} {
  func.func @stn_kernel(%arg0: i32, %arg1: memref<2x512xf32, #tpu.memory_space<vmem>>, %arg2: memref<6x512xf32, #tpu.memory_space<vmem>>, %arg3: memref<6x1xf32, #tpu.memory_space<vmem>>, %arg4: memref<5x128xf32, #tpu.memory_space<vmem>>, %arg5: memref<32x32xf32, #tpu.memory_space<vmem>>, %arg6: memref<2x128xf32, #tpu.memory_space<vmem>>, %arg7: memref<32x128xf32, #tpu.memory_space<vmem>>) attributes {dimension_semantics = [#tpu.dimension_semantics<arbitrary>], iteration_bounds = array<i64: 1>, scalar_prefetch = 0 : i64, scratch_operands = 0 : i64, tpu.core_type = #tpu.core_type<tc>, window_params = [{pipeline_mode = #tpu.pipeline_mode<synchronous>, transform_indices = @transform_0, window_bounds = array<i64: 2, 512>}, {pipeline_mode = #tpu.pipeline_mode<synchronous>, transform_indices = @transform_1, window_bounds = array<i64: 6, 512>}, {pipeline_mode = #tpu.pipeline_mode<synchronous>, transform_indices = @transform_2, window_bounds = array<i64: 6, 1>}, {pipeline_mode = #tpu.pipeline_mode<synchronous>, transform_indices = @transform_3, window_bounds = array<i64: 5, 128>}, {pipeline_mode = #tpu.pipeline_mode<synchronous>, transform_indices = @transform_4, window_bounds = array<i64: 32, 32>}, {pipeline_mode = #tpu.pipeline_mode<synchronous>, transform_indices = @transform_5, window_bounds = array<i64: 2, 128>}, {pipeline_mode = #tpu.pipeline_mode<synchronous>, transform_indices = @transform_6, window_bounds = array<i64: 32, 128>}]} {
    %c0 = arith.constant 0 : index
    %c0_0 = arith.constant 0 : index
    %0 = vector.load %arg2[%c0, %c0_0] : memref<6x512xf32, #tpu.memory_space<vmem>>, vector<6x512xf32>
    %c0_1 = arith.constant 0 : index
    %c0_2 = arith.constant 0 : index
    %1 = vector.load %arg1[%c0_1, %c0_2] : memref<2x512xf32, #tpu.memory_space<vmem>>, vector<2x512xf32>
    %cst = arith.constant dense<0.000000e+00> : vector<6x2xf32>
    %2 = tpu.matmul %0, %1, %cst {dimension_numbers = #tpu.dot_dimension_numbers<[1], [1], [0], [0], [0, 0, 1, 0], [], []>} : vector<6x512xf32>, vector<2x512xf32>, vector<6x2xf32> -> vector<6x2xf32>
    %c0_3 = arith.constant 0 : index
    %c0_4 = arith.constant 0 : index
    %3 = vector.load %arg3[%c0_3, %c0_4] : memref<6x1xf32, #tpu.memory_space<vmem>>, vector<6x1xf32>
    %4 = vector.broadcast %3 : vector<6x1xf32> to vector<6x2xf32>
    %5 = arith.addf %2, %4 : vector<6x2xf32>
    %c0_5 = arith.constant 0 : index
    %c0_6 = arith.constant 0 : index
    %6 = vector.load %arg4[%c0_5, %c0_6] : memref<5x128xf32, #tpu.memory_space<vmem>>, vector<2x128xf32>
    %c2 = arith.constant 2 : index
    %c0_7 = arith.constant 0 : index
    %7 = vector.load %arg4[%c2, %c0_7] : memref<5x128xf32, #tpu.memory_space<vmem>>, vector<1x128xf32>
    %c3 = arith.constant 3 : index
    %c0_8 = arith.constant 0 : index
    %8 = vector.load %arg4[%c3, %c0_8] : memref<5x128xf32, #tpu.memory_space<vmem>>, vector<1x128xf32>
    %c4 = arith.constant 4 : index
    %c0_9 = arith.constant 0 : index
    %9 = vector.load %arg4[%c4, %c0_9] : memref<5x128xf32, #tpu.memory_space<vmem>>, vector<1x128xf32>
    %10 = arith.fptosi %9 : vector<1x128xf32> to vector<1x128xi32>
    %cst_10 = arith.constant dense<0.000000e+00> : vector<6x128xf32>
    %11 = tpu.matmul %5, %6, %cst_10 {dimension_numbers = #tpu.dot_dimension_numbers<[1], [0], [0], [1], [0, 0, 1, 1], [], []>} : vector<6x2xf32>, vector<2x128xf32>, vector<6x128xf32> -> vector<6x128xf32>
    %12 = vector.extract_strided_slice %11 {offsets = [0, 0], sizes = [1, 128], strides = [1, 1]} : vector<6x128xf32> to vector<1x128xf32>
    %13 = arith.mulf %12, %7 : vector<1x128xf32>
    %14 = vector.extract_strided_slice %11 {offsets = [1, 0], sizes = [1, 128], strides = [1, 1]} : vector<6x128xf32> to vector<1x128xf32>
    %15 = arith.mulf %14, %8 : vector<1x128xf32>
    %16 = arith.addf %13, %15 : vector<1x128xf32>
    %17 = vector.extract_strided_slice %11 {offsets = [2, 0], sizes = [1, 128], strides = [1, 1]} : vector<6x128xf32> to vector<1x128xf32>
    %18 = arith.addf %16, %17 : vector<1x128xf32>
    %19 = vector.extract_strided_slice %11 {offsets = [3, 0], sizes = [1, 128], strides = [1, 1]} : vector<6x128xf32> to vector<1x128xf32>
    %20 = arith.mulf %19, %7 : vector<1x128xf32>
    %21 = vector.extract_strided_slice %11 {offsets = [4, 0], sizes = [1, 128], strides = [1, 1]} : vector<6x128xf32> to vector<1x128xf32>
    %22 = arith.mulf %21, %8 : vector<1x128xf32>
    %23 = arith.addf %20, %22 : vector<1x128xf32>
    %24 = vector.extract_strided_slice %11 {offsets = [5, 0], sizes = [1, 128], strides = [1, 1]} : vector<6x128xf32> to vector<1x128xf32>
    %25 = arith.addf %23, %24 : vector<1x128xf32>
    %26 = tpu.concatenate %18, %25 in 0 : vector<1x128xf32>, vector<1x128xf32> -> vector<2x128xf32>
    %c0_11 = arith.constant 0 : index
    %c0_12 = arith.constant 0 : index
    %27 = vector.load %arg6[%c0_11, %c0_12] : memref<2x128xf32, #tpu.memory_space<vmem>>, vector<2x128xf32>
    tpu.vector_store %arg6[%c0_11, %c0_12], %26 {strides = array<i32>} : memref<2x128xf32, #tpu.memory_space<vmem>>, vector<2x128xf32>,
    %cst_13 = arith.constant 1.000000e+00 : f32
    %28 = vector.broadcast %cst_13 : f32 to vector<1x128xf32>
    %29 = arith.addf %18, %28 : vector<1x128xf32>
    %cst_14 = arith.constant 2.000000e+00 : f32
    %30 = vector.broadcast %cst_14 : f32 to vector<1x128xf32>
    %31 = arith.mulf %29, %30 : vector<1x128xf32>
    %cst_15 = arith.constant 5.000000e-01 : f32
    %32 = vector.broadcast %cst_15 : f32 to vector<1x128xf32>
    %33 = arith.subf %31, %32 : vector<1x128xf32>
    %cst_16 = arith.constant 1.000000e+00 : f32
    %34 = vector.broadcast %cst_16 : f32 to vector<1x128xf32>
    %35 = arith.addf %25, %34 : vector<1x128xf32>
    %cst_17 = arith.constant 2.000000e+00 : f32
    %36 = vector.broadcast %cst_17 : f32 to vector<1x128xf32>
    %37 = arith.mulf %35, %36 : vector<1x128xf32>
    %cst_18 = arith.constant 5.000000e-01 : f32
    %38 = vector.broadcast %cst_18 : f32 to vector<1x128xf32>
    %39 = arith.subf %37, %38 : vector<1x128xf32>
    %40 = math.floor %33 : vector<1x128xf32>
    %41 = math.floor %39 : vector<1x128xf32>
    %42 = arith.fptosi %40 : vector<1x128xf32> to vector<1x128xi32>
    %43 = arith.fptosi %41 : vector<1x128xf32> to vector<1x128xi32>
    %c1_i32 = arith.constant 1 : i32
    %44 = vector.broadcast %c1_i32 : i32 to vector<1x128xi32>
    %45 = arith.addi %42, %44 : vector<1x128xi32>
    %c1_i32_19 = arith.constant 1 : i32
    %46 = vector.broadcast %c1_i32_19 : i32 to vector<1x128xi32>
    %47 = arith.addi %43, %46 : vector<1x128xi32>
    %48 = arith.subf %33, %40 : vector<1x128xf32>
    %cst_20 = arith.constant 1.000000e+00 : f32
    %49 = vector.broadcast %cst_20 : f32 to vector<1x128xf32>
    %50 = arith.subf %49, %48 : vector<1x128xf32>
    %51 = arith.subf %39, %41 : vector<1x128xf32>
    %cst_21 = arith.constant 1.000000e+00 : f32
    %52 = vector.broadcast %cst_21 : f32 to vector<1x128xf32>
    %53 = arith.subf %52, %51 : vector<1x128xf32>
    %54 = tpu.iota {dimensions = array<i32: 0>} : vector<32x128xi32>
    %55 = arith.mulf %50, %53 : vector<1x128xf32>
    %c0_i32 = arith.constant 0 : i32
    %56 = vector.broadcast %c0_i32 : i32 to vector<1x128xi32>
    %57 = arith.cmpi sge, %42, %56 : vector<1x128xi32>
    %c4_i32 = arith.constant 4 : i32
    %58 = vector.broadcast %c4_i32 : i32 to vector<1x128xi32>
    %59 = arith.cmpi slt, %42, %58 : vector<1x128xi32>
    %60 = arith.andi %57, %59 : vector<1x128xi1>
    %c0_i32_22 = arith.constant 0 : i32
    %61 = vector.broadcast %c0_i32_22 : i32 to vector<1x128xi32>
    %62 = arith.cmpi sge, %43, %61 : vector<1x128xi32>
    %63 = arith.andi %60, %62 : vector<1x128xi1>
    %c4_i32_23 = arith.constant 4 : i32
    %64 = vector.broadcast %c4_i32_23 : i32 to vector<1x128xi32>
    %65 = arith.cmpi slt, %43, %64 : vector<1x128xi32>
    %66 = arith.andi %63, %65 : vector<1x128xi1>
    %c4_i32_24 = arith.constant 4 : i32
    %67 = vector.broadcast %c4_i32_24 : i32 to vector<1x128xi32>
    %68 = arith.muli %43, %67 : vector<1x128xi32>
    %69 = arith.addi %10, %68 : vector<1x128xi32>
    %70 = arith.addi %69, %42 : vector<1x128xi32>
    %c-1_i32 = arith.constant -1 : i32
    %71 = vector.broadcast %c-1_i32 : i32 to vector<1x128xi32>
    %72 = arith.select %66, %70, %71 : vector<1x128xi1>, vector<1x128xi32>
    %cst_25 = arith.constant 0.000000e+00 : f32
    %73 = vector.broadcast %cst_25 : f32 to vector<1x128xf32>
    %74 = arith.select %66, %55, %73 : vector<1x128xi1>, vector<1x128xf32>
    %75 = vector.broadcast %72 : vector<1x128xi32> to vector<32x128xi32>
    %76 = arith.cmpi eq, %54, %75 : vector<32x128xi32>
    %cst_26 = arith.constant 0.000000e+00 : f32
    %77 = vector.shape_cast %74 : vector<1x128xf32> to vector<1x128xf32>
    %78 = vector.broadcast %77 : vector<1x128xf32> to vector<32x128xf32>
    %79 = vector.broadcast %cst_26 : f32 to vector<32x128xf32>
    %80 = arith.select %76, %78, %79 : vector<32x128xi1>, vector<32x128xf32>
    %81 = arith.mulf %48, %53 : vector<1x128xf32>
    %c0_i32_27 = arith.constant 0 : i32
    %82 = vector.broadcast %c0_i32_27 : i32 to vector<1x128xi32>
    %83 = arith.cmpi sge, %45, %82 : vector<1x128xi32>
    %c4_i32_28 = arith.constant 4 : i32
    %84 = vector.broadcast %c4_i32_28 : i32 to vector<1x128xi32>
    %85 = arith.cmpi slt, %45, %84 : vector<1x128xi32>
    %86 = arith.andi %83, %85 : vector<1x128xi1>
    %c0_i32_29 = arith.constant 0 : i32
    %87 = vector.broadcast %c0_i32_29 : i32 to vector<1x128xi32>
    %88 = arith.cmpi sge, %43, %87 : vector<1x128xi32>
    %89 = arith.andi %86, %88 : vector<1x128xi1>
    %c4_i32_30 = arith.constant 4 : i32
    %90 = vector.broadcast %c4_i32_30 : i32 to vector<1x128xi32>
    %91 = arith.cmpi slt, %43, %90 : vector<1x128xi32>
    %92 = arith.andi %89, %91 : vector<1x128xi1>
    %c4_i32_31 = arith.constant 4 : i32
    %93 = vector.broadcast %c4_i32_31 : i32 to vector<1x128xi32>
    %94 = arith.muli %43, %93 : vector<1x128xi32>
    %95 = arith.addi %10, %94 : vector<1x128xi32>
    %96 = arith.addi %95, %45 : vector<1x128xi32>
    %c-1_i32_32 = arith.constant -1 : i32
    %97 = vector.broadcast %c-1_i32_32 : i32 to vector<1x128xi32>
    %98 = arith.select %92, %96, %97 : vector<1x128xi1>, vector<1x128xi32>
    %cst_33 = arith.constant 0.000000e+00 : f32
    %99 = vector.broadcast %cst_33 : f32 to vector<1x128xf32>
    %100 = arith.select %92, %81, %99 : vector<1x128xi1>, vector<1x128xf32>
    %101 = vector.broadcast %98 : vector<1x128xi32> to vector<32x128xi32>
    %102 = arith.cmpi eq, %54, %101 : vector<32x128xi32>
    %cst_34 = arith.constant 0.000000e+00 : f32
    %103 = vector.shape_cast %100 : vector<1x128xf32> to vector<1x128xf32>
    %104 = vector.broadcast %103 : vector<1x128xf32> to vector<32x128xf32>
    %105 = vector.broadcast %cst_34 : f32 to vector<32x128xf32>
    %106 = arith.select %102, %104, %105 : vector<32x128xi1>, vector<32x128xf32>
    %107 = arith.addf %80, %106 : vector<32x128xf32>
    %108 = arith.mulf %50, %51 : vector<1x128xf32>
    %c0_i32_35 = arith.constant 0 : i32
    %109 = vector.broadcast %c0_i32_35 : i32 to vector<1x128xi32>
    %110 = arith.cmpi sge, %42, %109 : vector<1x128xi32>
    %c4_i32_36 = arith.constant 4 : i32
    %111 = vector.broadcast %c4_i32_36 : i32 to vector<1x128xi32>
    %112 = arith.cmpi slt, %42, %111 : vector<1x128xi32>
    %113 = arith.andi %110, %112 : vector<1x128xi1>
    %c0_i32_37 = arith.constant 0 : i32
    %114 = vector.broadcast %c0_i32_37 : i32 to vector<1x128xi32>
    %115 = arith.cmpi sge, %47, %114 : vector<1x128xi32>
    %116 = arith.andi %113, %115 : vector<1x128xi1>
    %c4_i32_38 = arith.constant 4 : i32
    %117 = vector.broadcast %c4_i32_38 : i32 to vector<1x128xi32>
    %118 = arith.cmpi slt, %47, %117 : vector<1x128xi32>
    %119 = arith.andi %116, %118 : vector<1x128xi1>
    %c4_i32_39 = arith.constant 4 : i32
    %120 = vector.broadcast %c4_i32_39 : i32 to vector<1x128xi32>
    %121 = arith.muli %47, %120 : vector<1x128xi32>
    %122 = arith.addi %10, %121 : vector<1x128xi32>
    %123 = arith.addi %122, %42 : vector<1x128xi32>
    %c-1_i32_40 = arith.constant -1 : i32
    %124 = vector.broadcast %c-1_i32_40 : i32 to vector<1x128xi32>
    %125 = arith.select %119, %123, %124 : vector<1x128xi1>, vector<1x128xi32>
    %cst_41 = arith.constant 0.000000e+00 : f32
    %126 = vector.broadcast %cst_41 : f32 to vector<1x128xf32>
    %127 = arith.select %119, %108, %126 : vector<1x128xi1>, vector<1x128xf32>
    %128 = vector.broadcast %125 : vector<1x128xi32> to vector<32x128xi32>
    %129 = arith.cmpi eq, %54, %128 : vector<32x128xi32>
    %cst_42 = arith.constant 0.000000e+00 : f32
    %130 = vector.shape_cast %127 : vector<1x128xf32> to vector<1x128xf32>
    %131 = vector.broadcast %130 : vector<1x128xf32> to vector<32x128xf32>
    %132 = vector.broadcast %cst_42 : f32 to vector<32x128xf32>
    %133 = arith.select %129, %131, %132 : vector<32x128xi1>, vector<32x128xf32>
    %134 = arith.addf %107, %133 : vector<32x128xf32>
    %135 = arith.mulf %48, %51 : vector<1x128xf32>
    %c0_i32_43 = arith.constant 0 : i32
    %136 = vector.broadcast %c0_i32_43 : i32 to vector<1x128xi32>
    %137 = arith.cmpi sge, %45, %136 : vector<1x128xi32>
    %c4_i32_44 = arith.constant 4 : i32
    %138 = vector.broadcast %c4_i32_44 : i32 to vector<1x128xi32>
    %139 = arith.cmpi slt, %45, %138 : vector<1x128xi32>
    %140 = arith.andi %137, %139 : vector<1x128xi1>
    %c0_i32_45 = arith.constant 0 : i32
    %141 = vector.broadcast %c0_i32_45 : i32 to vector<1x128xi32>
    %142 = arith.cmpi sge, %47, %141 : vector<1x128xi32>
    %143 = arith.andi %140, %142 : vector<1x128xi1>
    %c4_i32_46 = arith.constant 4 : i32
    %144 = vector.broadcast %c4_i32_46 : i32 to vector<1x128xi32>
    %145 = arith.cmpi slt, %47, %144 : vector<1x128xi32>
    %146 = arith.andi %143, %145 : vector<1x128xi1>
    %c4_i32_47 = arith.constant 4 : i32
    %147 = vector.broadcast %c4_i32_47 : i32 to vector<1x128xi32>
    %148 = arith.muli %47, %147 : vector<1x128xi32>
    %149 = arith.addi %10, %148 : vector<1x128xi32>
    %150 = arith.addi %149, %45 : vector<1x128xi32>
    %c-1_i32_48 = arith.constant -1 : i32
    %151 = vector.broadcast %c-1_i32_48 : i32 to vector<1x128xi32>
    %152 = arith.select %146, %150, %151 : vector<1x128xi1>, vector<1x128xi32>
    %cst_49 = arith.constant 0.000000e+00 : f32
    %153 = vector.broadcast %cst_49 : f32 to vector<1x128xf32>
    %154 = arith.select %146, %135, %153 : vector<1x128xi1>, vector<1x128xf32>
    %155 = vector.broadcast %152 : vector<1x128xi32> to vector<32x128xi32>
    %156 = arith.cmpi eq, %54, %155 : vector<32x128xi32>
    %cst_50 = arith.constant 0.000000e+00 : f32
    %157 = vector.shape_cast %154 : vector<1x128xf32> to vector<1x128xf32>
    %158 = vector.broadcast %157 : vector<1x128xf32> to vector<32x128xf32>
    %159 = vector.broadcast %cst_50 : f32 to vector<32x128xf32>
    %160 = arith.select %156, %158, %159 : vector<32x128xi1>, vector<32x128xf32>
    %161 = arith.addf %134, %160 : vector<32x128xf32>
    %c0_51 = arith.constant 0 : index
    %c0_52 = arith.constant 0 : index
    %162 = vector.load %arg5[%c0_51, %c0_52] : memref<32x32xf32, #tpu.memory_space<vmem>>, vector<32x32xf32>
    %cst_53 = arith.constant dense<0.000000e+00> : vector<32x128xf32>
    %163 = tpu.matmul %162, %161, %cst_53 {dimension_numbers = #tpu.dot_dimension_numbers<[1], [0], [0], [1], [0, 0, 1, 1], [], []>} : vector<32x32xf32>, vector<32x128xf32>, vector<32x128xf32> -> vector<32x128xf32>
    %c0_54 = arith.constant 0 : index
    %c0_55 = arith.constant 0 : index
    %164 = vector.load %arg7[%c0_54, %c0_55] : memref<32x128xf32, #tpu.memory_space<vmem>>, vector<32x128xf32>
    tpu.vector_store %arg7[%c0_54, %c0_55], %163 {strides = array<i32>} : memref<32x128xf32, #tpu.memory_space<vmem>>, vector<32x128xf32>,
    return
  }
  func.func @transform_0(%arg0: i32) -> (i32, i32) {
    %c0_i32 = arith.constant 0 : i32
    %c0_i32_0 = arith.constant 0 : i32
    %c0_i32_1 = arith.constant 0 : i32
    return %c0_i32, %c0_i32_0 : i32, i32
  }
  func.func @transform_1(%arg0: i32) -> (i32, i32) {
    %c0_i32 = arith.constant 0 : i32
    %c0_i32_0 = arith.constant 0 : i32
    %c0_i32_1 = arith.constant 0 : i32
    return %c0_i32, %c0_i32_0 : i32, i32
  }
  func.func @transform_2(%arg0: i32) -> (i32, i32) {
    %c0_i32 = arith.constant 0 : i32
    %c0_i32_0 = arith.constant 0 : i32
    %c0_i32_1 = arith.constant 0 : i32
    return %c0_i32, %c0_i32_0 : i32, i32
  }
  func.func @transform_3(%arg0: i32) -> (i32, i32) {
    %c0_i32 = arith.constant 0 : i32
    %c0_i32_0 = arith.constant 0 : i32
    %c0_i32_1 = arith.constant 0 : i32
    return %c0_i32, %c0_i32_0 : i32, i32
  }
  func.func @transform_4(%arg0: i32) -> (i32, i32) {
    %c0_i32 = arith.constant 0 : i32
    %c0_i32_0 = arith.constant 0 : i32
    %c0_i32_1 = arith.constant 0 : i32
    return %c0_i32, %c0_i32_0 : i32, i32
  }
  func.func @transform_5(%arg0: i32) -> (i32, i32) {
    %c0_i32 = arith.constant 0 : i32
    %c0_i32_0 = arith.constant 0 : i32
    %c0_i32_1 = arith.constant 0 : i32
    return %c0_i32, %c0_i32_0 : i32, i32
  }
  func.func @transform_6(%arg0: i32) -> (i32, i32) {
    %c0_i32 = arith.constant 0 : i32
    %c0_i32_0 = arith.constant 0 : i32
    %c0_i32_1 = arith.constant 0 : i32
    return %c0_i32, %c0_i32_0 : i32, i32
  }
}

</mosaic_0001>

<bundles_post_ra>
// kernel: spatial_transformer.1
= control target key start
LH: loop header
LB: loop body
LE: loop exit
PB: predicated region body
PF: predicated region fallthrough
CT: control target
= control target key end

     0   :  { %v38_v0 = vlaneseq  ;;  %v638_v1 = vmov 1983009808   ;;  %v639_v4 = vmov 0   ;;  %v640_v17 = vmov 0.0   ;;  %s841_s0 = inlined_call_operand.vmem [shape: f32[2,512], index: 0, kind: input, shape index: {}]   ;;  %s842_s1 = inlined_call_operand.vmem [shape: f32[6,512], index: 1, kind: input, shape index: {}]   ;;  %s843_s2 = inlined_call_operand.vmem [shape: f32[6,1], index: 2, kind: input, shape index: {}]   ;;  %s844_s3 = inlined_call_operand.vmem [shape: f32[5,128], index: 3, kind: input, shape index: {}]   ;;  %s845_s4 = inlined_call_operand.vmem [shape: f32[32,32], index: 4, kind: input, shape index: {}]   ;;  %s846_s5 = inlined_call_operand.vmem [shape: f32[2,128], index: 5, kind: output, shape index: {0}]   ;;  %s847_s6 = inlined_call_operand.vmem [shape: f32[32,128], index: 6, kind: output, shape index: {1}]  }
   0x1   :  { %v36_v2 = vunpack.c.l.s4 %v638_v1  ;;  %v23_v3 = vld [vmem:[%s842_s1 + $0x8] sm:$0x3f]  ;;  %636 = vset.pattern.permute.xlu0 %v639_v4  ;;  %v26_v5 = vld [vmem:[%s841_s0] sm:$0xff]  ;;  %v25_v16 = vld [vmem:[%s842_s1 + $0x18] sm:$0x3f]  ;;  %vm204_vm0 = vcmask 1041408  }
   0x2   :  { %v684_v6 = vshrl.u32 %v38_v0, 7  ;;  %119 = vmatprep.mubr.f32.mxu0 %v23_v3  ;;  %v34_v7 = vcombine.high %v26_v5, %v26_v5  ;;  %v27_v9 = vld [vmem:[%s843_s2] sm:$0x3f]  ;;  %v24_v18 = vld [vmem:[%s842_s1 + $0x10] sm:$0x3f]  ;;  %vm641_vm1 = vmmov 0  }
   0x3   :  { %v37_v8 = vunpack.c.0.s8 %v36_v2  ;;  %30 = vperm.xlu0 %636, %v27_v9   ;;  %v22_v15 = vld [vmem:[%s842_s1] sm:$0x3f]  ;;  %vm200_vm2 = vcmask 15360   ;;  %vm468_vm3 = vcmask 261120   ;;  %vm306_vm4 = vcmask 1040384  }
   0x4   :  { %v195_v19 = vld [vmem:[%s844_s3] sm:$0x3]  ;;  %v196_v25 = vld [vmem:[%s844_s3 + $0x2] sm:$0x1]  ;;  %v197_v26 = vld [vmem:[%s844_s3 + $0x3] sm:$0x1] }
   0x5   :  { %v40_v10 = vsub.s32 %v37_v8, %v684_v6  ;;  %v464_v24 = vld [vmem:[%s845_s4] sm:$0xff]  ;;  %v280_v27 = vrot.slane %v197_v26, 7  ;;  %v292_v28 = vrot.slane %v196_v25, 5  ;;  %v295_v29 = vrot.slane %v197_v26, 4 }
   0x6   :  { %609 = vmatprep.mubr.msk.f32.mxu1 %vm468_vm3, %v464_v24  ;;  %v198_v49 = vld [vmem:[%s844_s3 + $0x4] sm:$0x1]  ;;  %v466_v24 = vld [vmem:[%s845_s4 + $0x10] sm:$0xff] }
   0x7   :  { %v41_v11 = vrot.slane %v26_v5, %v40_v10  ;;  %v48_v12 = vrot.slane %v34_v7, %v40_v10  ;;  %v626_v53 = vtrunc.f32 %v198_v49 }
   0x9   :  { %v49_v13 = vcombine.high %v41_v11, %v41_v11  ;;  %v50_v14 = vcombine.high %v48_v12, %v48_v12  ;;  %v627_v60 = vcvt.f32.s32 %v626_v53 }
   0xb   :  { %55 = vmatprep.subr.mxu0 %v49_v13 }
   0xc   :  { %56 = vmatpush1.xpose.msra.mxu0 %v41_v11 }
   0xd   :  { %125 = vmatprep.subr.mxu0 %v50_v14 }
   0xf   :  { %120 = vmatmul.mubr.f32.vlgmr.msra.gmra.mrb[0].mxu0 %v22_v15 }
  0x10   :  { %126 = vmatpush1.xpose.msra.mxu0 %v48_v12  ;;  %189 = vmatprep.mubr.f32.mxu0 %v25_v16 }
  0x11   :  { %596 = vmatprep.subr.mxu0 %v640_v17 }
  0x17   :  { %190 = vmatmul.mubr.f32.vlgmr.msra.gmra.mrb[0].mxu0 %v24_v18 }
  0x18   :  { %597 = vmatpush3.msk.msra.mxu0 %vm204_vm0, %v195_v19  ;;  %598 = vmatprep.mubr.msk.f32.mxu0 %vm641_vm1, %v640_v17 }
  0x82   :  { %v31_v20 = vpop.permute.xlu0 %30 }
  0xea   :  { %v191_v21 = vpop.f32.mrb[0].mxu0 }
  0xeb   :  { %v623_v22 = vadd.f32 %v191_v21, %v31_v20  ;;  %v193_v23 = vpop.f32.mrb[1].mxu0 }
  0xed   :  { %599 = vmatmul.mubr.msk.f32.vlgmr.msra.gmra.mrb[2].mxu0 %vm200_vm2, %v623_v22 }
 0x1c0   :  { %v274_v30 = vpop.f32.mrb[2].mxu0 }
 0x1c1   :  { %v278_v31 = vmul.f32 %v274_v30, %v196_v25  ;;  %v282_v32 = vmul.f32 %v280_v27, %v274_v30  ;;  %v294_v33 = vmul.f32 %v292_v28, %v274_v30  ;;  %v600_v34 = vpop.f32.mrb[3].mxu0  ;;  %v297_v35 = vmul.f32 %v295_v29, %v274_v30 }
 0x1c2   :  { %v288_v39 = vrot.slane %v274_v30, 2  ;;  %v355_v25 = vsub.s32 0, %v684_v6 }
 0x1c3   :  { %v284_v36 = vrot.slane %v282_v32, 1  ;;  %v299_v37 = vrot.slane %v297_v35, 1 }
 0x1c5   :  { %v286_v38 = vadd.f32 %v284_v36, %v278_v31  ;;  %v301_v40 = vadd.f32 %v299_v37, %v294_v33  ;;  %v327_v31 = vadd.s32 8, %v684_v6 }
 0x1c7   :  { %v290_v41 = vadd.f32 %v288_v39, %v286_v38  ;;  %v302_v42 = vadd.f32 %v301_v40, %v288_v39 }
 0x1c9   :  { %v309_v43 = vadd.f32 1.0, %v290_v41  ;;  %v304_v44 = vrot.slane %v302_v42, 2  ;;  %v312_v45 = vadd.f32 1.0, %v302_v42 }
 0x1cb   :  { %v310_v46 = vmul.f32 2.0, %v309_v43  ;;  %v307_v47 = vsel %vm306_vm4, %v290_v41, %v304_v44  ;;  %v313_v48 = vmul.f32 2.0, %v312_v45  ;;  %v328_v41 = vadd.s32 16, %v684_v6 }
 0x1cc   :  { %308 = vst [vmem:[%s846_s5] sm:$0x3] %v307_v47  ;;  %v329_v45 = vadd.s32 24, %v684_v6 }
 0x1cd   :  { %v580_v50 = vadd.f32 -0.5, %v310_v46  ;;  %v581_v51 = vadd.f32 -0.5, %v313_v48 }
 0x1cf   :  { %v315_v52 = vfloor.f32 %v580_v50  ;;  %v316_v54 = vfloor.f32 %v581_v51 }
 0x1d1   :  { %v628_v55 = vtrunc.f32 %v315_v52  ;;  %v321_v56 = vsub.f32 %v580_v50, %v315_v52  ;;  %v630_v57 = vtrunc.f32 %v316_v54  ;;  %v323_v58 = vsub.f32 %v581_v51, %v316_v54 }
 0x1d3   :  { %v718_v59 = vcvt.f32.s32 %v628_v55  ;;  %v631_v61 = vcvt.f32.s32 %v630_v57  ;;  %v324_v62 = vsub.f32 1.0, %v323_v58  ;;  %v322_v63 = vsub.f32 1.0, %v321_v56 }
 0x1d4   :  { %v399_v1 = vrot.slane %v323_v58, 3 }
 0x1d5   :  { %v721_v0 = vadd.s32 1, %v718_v59  ;;  %vm334_vm5 = vcmp.ge.s32.totalorder %v718_v59, 0  ;;  %vm335_vm6 = vcmp.lt.s32.totalorder %v718_v59, 4  ;;  %v331_v2 = vrot.slane %v324_v62, 3 }
 0x1d6   :  { %v320_v3 = vadd.s32 1, %v631_v61  ;;  %vm337_vm7 = vcmp.ge.s32.totalorder %v631_v61, 0  ;;  %vm342_vm8 = vcmp.lt.s32.totalorder %v631_v61, 4  ;;  %v347_v8 = vmul.u32 4, %v631_v61  ;;  %vm730_vm10 = vmand %vm334_vm5, %vm335_vm6 }
 0x1d7   :  { %v338_v5 = vsel %vm337_vm7, 1, %v639_v4  ;;  %v343_v7 = vsel %vm342_vm8, 1, %v639_v4  ;;  %vm370_vm9 = vcmp.ge.s32.totalorder %v721_v0, 0  ;;  %v333_v9 = vmul.f32 %v331_v2, %v322_v63 }
 0x1d8   :  { %v339_v10 = vrot.slane %v338_v5, 3  ;;  %v344_v11 = vrot.slane %v343_v7, 3  ;;  %v369_v12 = vmul.f32 %v331_v2, %v321_v56  ;;  %v348_v14 = vrot.slane %v347_v8, 3 }
 0x1d9   :  { %vm371_vm11 = vcmp.lt.s32.totalorder %v721_v0, 4  ;;  %v401_v15 = vmul.f32 %v399_v1, %v322_v63  ;;  %vm402_vm12 = vcmp.ge.s32.totalorder %v320_v3, 0  ;;  %vm407_vm0 = vcmp.lt.s32.totalorder %v320_v3, 4 }
 0x1da   :  { %vm735_vm13 = vcmp.ne.s32.totalorder %v339_v10, 0  ;;  %vm739_vm14 = vcmp.ne.s32.totalorder %v344_v11, 0  ;;  %vm743_vm15 = vmand %vm370_vm9, %vm371_vm11  ;;  %v403_v19 = vsel %vm402_vm12, 1, %v639_v4  ;;  %v349_v20 = vadd.s32 %v627_v60, %v348_v14 }
 0x1db   :  { %vm341_vm1 = vmand %vm730_vm10, %vm735_vm13  ;;  %v404_v21 = vrot.slane %v403_v19, 3  ;;  %v408_v22 = vsel %vm407_vm0, 1, %v639_v4  ;;  %v412_v23 = vmul.u32 4, %v320_v3  ;;  %v438_v27 = vmul.f32 %v399_v1, %v321_v56 }
 0x1dc   :  { %vm755_vm2 = vmand %vm341_vm1, %vm739_vm14  ;;  %v409_v26 = vrot.slane %v408_v22, 3  ;;  %v350_v28 = vadd.s32 %v718_v59, %v349_v20  ;;  %v375_v4 = vadd.s32 %v349_v20, %v721_v0 }
 0x1dd   :  { %v352_v29 = vsel %vm755_vm2, %v333_v9, 0.0  ;;  %vm373_vm4 = vmand %vm743_vm15, %vm735_vm13  ;;  %vm768_vm5 = vcmp.ne.s32.totalorder %v404_v21, 0  ;;  %v413_v33 = vrot.slane %v412_v23, 3  ;;  %v465_v23 = vld [vmem:[%s845_s4 + $0x8] sm:$0xff] }
 0x1de   :  { %vm374_vm6 = vmand %vm373_vm4, %vm739_vm14  ;;  %vm775_vm7 = vcmp.ne.s32.totalorder %v409_v26, 0  ;;  %v351_v34 = vsel %vm755_vm2, %v350_v28, 4294967295  ;;  %v364_v42 = vrot.slane %v352_v29, %v355_v25 }
 0x1df   :  { %v376_v35 = vsel %vm374_vm6, %v375_v4, 4294967295  ;;  %v377_v36 = vsel %vm374_vm6, %v369_v12, 0.0  ;;  %vm406_vm8 = vmand %vm730_vm10, %vm768_vm5  ;;  %v356_v37 = vrot.slane %v351_v34, %v355_v25  ;;  %v414_v40 = vadd.s32 %v627_v60, %v413_v33 }
 0x1e0   :  { %v381_v38 = vrot.slane %v376_v35, %v355_v25  ;;  %vm787_vm9 = vmand %vm406_vm8, %vm775_vm7  ;;  %v389_v43 = vrot.slane %v377_v36, %v355_v25 }
 0x1e1   :  { %v417_v44 = vsel %vm787_vm9, %v401_v15, 0.0  ;;  %vm439_vm10 = vmand %vm743_vm15, %vm768_vm5  ;;  %vm357_vm11 = vcmp.eq.s32.totalorder %v684_v6, %v356_v37  ;;  %vm358_vm12 = vcmp.eq.s32.totalorder %v327_v31, %v356_v37  ;;  %v415_v53 = vadd.s32 %v718_v59, %v414_v40 }
 0x1e2   :  { %vm382_vm13 = vcmp.eq.s32.totalorder %v684_v6, %v381_v38  ;;  %vm383_vm14 = vcmp.eq.s32.totalorder %v327_v31, %v381_v38  ;;  %vm803_vm0 = vmand %vm439_vm10, %vm775_vm7  ;;  %v365_v47 = vsel %vm357_vm11, %v364_v42, 0.0  ;;  %v366_v48 = vsel %vm358_vm12, %v364_v42, 0.0 }
 0x1e3   :  { %v390_v49 = vsel %vm382_vm13, %v389_v43, 0.0  ;;  %v391_v50 = vsel %vm383_vm14, %v389_v43, 0.0  ;;  %v441_v54 = vadd.s32 %v414_v40, %v721_v0  ;;  %v443_v55 = vsel %vm803_vm0, %v438_v27, 0.0 }
 0x1e4   :  { %v394_v51 = vadd.f32 %v390_v49, %v365_v47  ;;  %v395_v52 = vadd.f32 %v391_v50, %v366_v48  ;;  %vm359_vm15 = vcmp.eq.s32.totalorder %v328_v41, %v356_v37  ;;  %vm360_vm1 = vcmp.eq.s32.totalorder %v329_v45, %v356_v37 }
 0x1e5   :  { %v416_v56 = vsel %vm787_vm9, %v415_v53, 4294967295  ;;  %v429_v57 = vrot.slane %v417_v44, %v355_v25  ;;  %v367_v58 = vsel %vm359_vm15, %v364_v42, 0.0  ;;  %v368_v60 = vsel %vm360_vm1, %v364_v42, 0.0 }
 0x1e6   :  { %v421_v61 = vrot.slane %v416_v56, %v355_v25  ;;  %v442_v62 = vsel %vm803_vm0, %v441_v54, 4294967295  ;;  %vm384_vm2 = vcmp.eq.s32.totalorder %v328_v41, %v381_v38  ;;  %vm385_vm4 = vcmp.eq.s32.totalorder %v329_v45, %v381_v38 }
 0x1e7   :  { %v447_v59 = vrot.slane %v442_v62, %v355_v25  ;;  %v455_v63 = vrot.slane %v443_v55, %v355_v25  ;;  %v392_v0 = vsel %vm384_vm2, %v389_v43, 0.0  ;;  %v393_v1 = vsel %vm385_vm4, %v389_v43, 0.0  ;;  %v467_v25 = vld [vmem:[%s845_s4 + $0x18] sm:$0xff] }
 0x1e8   :  { %vm422_vm5 = vcmp.eq.s32.totalorder %v684_v6, %v421_v61  ;;  %vm423_vm6 = vcmp.eq.s32.totalorder %v327_v31, %v421_v61  ;;  %v396_v2 = vadd.f32 %v392_v0, %v367_v58  ;;  %v397_v3 = vadd.f32 %v393_v1, %v368_v60 }
 0x1e9   :  { %v430_v5 = vsel %vm422_vm5, %v429_v57, 0.0  ;;  %v431_v7 = vsel %vm423_vm6, %v429_v57, 0.0  ;;  %vm448_vm7 = vcmp.eq.s32.totalorder %v684_v6, %v447_v59  ;;  %vm449_vm8 = vcmp.eq.s32.totalorder %v327_v31, %v447_v59 }
 0x1ea   :  { %v434_v8 = vadd.f32 %v430_v5, %v394_v51  ;;  %v435_v9 = vadd.f32 %v431_v7, %v395_v52  ;;  %v456_v10 = vsel %vm448_vm7, %v455_v63, 0.0  ;;  %v457_v11 = vsel %vm449_vm8, %v455_v63, 0.0 }
 0x1eb   :  { %vm424_vm9 = vcmp.eq.s32.totalorder %v328_v41, %v421_v61  ;;  %vm425_vm10 = vcmp.eq.s32.totalorder %v329_v45, %v421_v61  ;;  %vm450_vm11 = vcmp.eq.s32.totalorder %v328_v41, %v447_v59  ;;  %vm451_vm12 = vcmp.eq.s32.totalorder %v329_v45, %v447_v59 }
 0x1ec   :  { %v460_v12 = vadd.f32 %v456_v10, %v434_v8  ;;  %v461_v13 = vadd.f32 %v457_v11, %v435_v9  ;;  %v432_v14 = vsel %vm424_vm9, %v429_v57, 0.0  ;;  %v433_v15 = vsel %vm425_vm10, %v429_v57, 0.0 }
 0x1ed   :  { %v436_v16 = vadd.f32 %v432_v14, %v396_v2  ;;  %v437_v17 = vadd.f32 %v433_v15, %v397_v3  ;;  %v458_v18 = vsel %vm450_vm11, %v455_v63, 0.0  ;;  %v459_v19 = vsel %vm451_vm12, %v455_v63, 0.0 }
 0x1ee   :  { %v615_v20 = vpack.c.bf16 %v461_v13, %v460_v12 }
 0x1ef   :  { %v462_v21 = vadd.f32 %v458_v18, %v436_v16  ;;  %v463_v6 = vadd.f32 %v459_v19, %v437_v17 }
 0x1f0   :  { %616 = vmatprep.subr.bf16.mxu1 %v615_v20 }
 0x1f1   :  { %618 = vmatpush3.bf16.msra.mxu1 %v615_v20  ;;  %v619_v22 = vpack.c.bf16 %v463_v6, %v462_v21 }
 0x1f3   :  { %620 = vmatprep.subr.bf16.mxu1 %v619_v22 }
 0x1f5   :  { %622 = vmatpush3.bf16.msra.mxu1 %v619_v22 }
 0x1f8   :  { %610 = vmatmul.mubr.msk.f32.vlgmr.msra.gmra.mrb[0].mxu1 %vm468_vm3, %v465_v23 }
 0x1f9   :  { %612 = vmatprep.mubr.msk.f32.mxu1 %vm468_vm3, %v466_v24 }
 0x1fc   :  { %613 = vmatmul.mubr.msk.f32.gmra.mrb[2].mxu1 %vm468_vm3, %v467_v25 }
 0x2cb   :  { %v611_v26 = vpop.f32.mrb[0].mxu1 }
 0x2cc   :  { %567 = vst [vmem:[%s847_s6 + $0x8] sm:$0xff] %v611_v26  ;;  %v547_v27 = vpop.f32.mrb[1].mxu1 }
 0x2cd   :  { %566 = vst [vmem:[%s847_s6] sm:$0xff] %v547_v27 }
 0x2cf   :  { %v614_v28 = vpop.f32.mrb[2].mxu1 }
 0x2d0   :  { %569 = vst [vmem:[%s847_s6 + $0x18] sm:$0xff] %v614_v28  ;;  %v557_v29 = vpop.f32.mrb[3].mxu1 }
 0x2d1   :  { %568 = vst [vmem:[%s847_s6 + $0x10] sm:$0xff] %v557_v29 }

</bundles_post_ra>
